<compile_context>
chip_gen: v7x
topology: tpu7x:2x2x1
jax: 0.10.0
libtpu: 0.0.40
codegen_flags: <defaults>
</compile_context>

<pallas_src>
import jax
import jax.numpy as jnp
from jax.experimental import pallas as pl
from jax.experimental.pallas import tpu as pltpu

EPS = 1e-5  # torch.nn.GroupNorm default


def res_mlp_block(x, gamma, beta, weight, bias, *, num_groups=32, tile_n=256,
                  vmem_limit_bytes=64 * 1024 * 1024):
    """x: (N, C); gamma, beta, bias: (C,); weight: (C_out, C_in) torch-style."""
    N, C = x.shape
    assert weight.shape == (C, C), "ResMlpBlock only runs when in_channels == out_channels"
    assert C % num_groups == 0
    G = num_groups
    gs = C // G
    inv_gs = 1.0 / float(gs)
    f32 = jnp.float32
    bf16 = jnp.bfloat16

    # 0/1 group-membership matrices (exact in bf16).  Pooling is a SUM via `memb` followed
    # by an exact f32 scale by 1/group_size, so the MXU operands carry no pooling-weight
    # rounding error.
    gid = jnp.arange(C) // gs
    memb = (gid[:, None] == jnp.arange(G)[None, :]).astype(bf16)      # (C, G)
    expand = (jnp.arange(G)[:, None] == gid[None, :]).astype(bf16)    # (G, C)

    # Fold GroupNorm affine into the Linear: y = xn @ (gamma * W^T) + (beta @ W^T + b).
    w_t = weight.astype(f32).T                                        # (C_in, C_out)
    w_fold = (gamma.astype(f32)[:, None] * w_t).astype(bf16)          # (C, C) bf16 MXU operand
    b_fold = (beta.astype(f32) @ w_t + bias.astype(f32)).reshape(1, C)  # (1, C) f32

    def kernel(x_ref, memb_ref, expand_ref, w_ref, b_ref, o_ref):
        x_in = x_ref[...]                                  # (tn, C), input dtype
        x_f32 = x_in.astype(f32)                           # GroupNorm32 computes in f32
        memb_b = memb_ref[...]                             # (C, G) bf16 0/1
        expand_b = expand_ref[...]                         # (G, C) bf16 0/1
        tn = x_f32.shape[0]

        # ---- GroupNorm statistics: re-centred two-pass, single-pass bf16 MXU pushes ----
        # 1) coarse per-group mean, used only as a centre (any per-group constant is
        #    algebraically valid, so bf16 operands are harmless here).
        m_g = jnp.dot(x_in.astype(bf16), memb_b,
                      preferred_element_type=f32) * inv_gs                      # (tn, G)
        m = jnp.dot(m_g.astype(bf16), expand_b, preferred_element_type=f32)     # (tn, C)
        r = x_f32 - m                                                           # small residuals
        # 2) residual mean + residual mean-of-squares in ONE MXU push (stack on sublanes).
        r_b = r.astype(bf16)
        pooled = jnp.dot(jnp.concatenate([r_b, r_b * r_b], axis=0), memb_b,
                         preferred_element_type=f32) * inv_gs                   # (2tn, G)
        s_g = pooled[:tn]                                                       # E[x - m]
        q_g = pooled[tn:]                                                       # E[(x - m)^2]
        var_g = jnp.maximum(q_g - s_g * s_g, 0.0)                               # shift-invariant
        inv_g = jax.lax.rsqrt(var_g + EPS)          # rsqrt on (tn, G): EUP work / group_size
        # 3) expand per-group (mean*inv, inv) back to channels in one push; then
        #    xn == (x - mean) * rsqrt(var + eps) via two cheap VPU ops.
        exp2 = jnp.dot(jnp.concatenate([s_g * inv_g, inv_g], axis=0).astype(bf16),
                       expand_b, preferred_element_type=f32)                    # (2tn, C)
        xn = r * exp2[tn:] - exp2[:tn]

        # ---- Linear (GroupNorm affine folded into W', b'): bf16 MXU, f32 accumulation ----
        y = jnp.dot(xn.astype(bf16), w_ref[...], preferred_element_type=f32) + b_ref[...]

        # ---- SiLU (EUP) + residual ----
        y = y * jax.nn.sigmoid(y)
        o_ref[...] = (x_f32 + y).astype(o_ref.dtype)

    # Big N-tiles amortize the resident weights and fill the MXU; the tail block (if
    # N % tn != 0) computes on padded rows whose results Pallas discards.
    # NOTE: at C < 128 (demo-only shape) the output is not lane-dense; production configs
    # use C >= 128 so stores are full-width.
    tn = min(tile_n, N)
    grid = (pl.cdiv(N, tn),)

    def _const_spec(shape):
        # Loop-invariant operand: block index never changes -> single buffer.
        return pl.BlockSpec(shape, lambda i: (0,) * len(shape),
                            pipeline_mode=pl.Buffered(1))

    return pl.pallas_call(
        kernel,
        out_shape=jax.ShapeDtypeStruct((N, C), x.dtype),
        grid_spec=pltpu.PrefetchScalarGridSpec(
            num_scalar_prefetch=0,
            grid=grid,
            in_specs=[
                pl.BlockSpec((tn, C), lambda i: (i, 0)),   # x tile (double-buffered)
                _const_spec((C, G)),                        # memb (bf16 0/1)
                _const_spec((G, C)),                        # expand (bf16 0/1)
                _const_spec((C, C)),                        # W' (bf16, affine folded)
                _const_spec((1, C)),                        # b' (f32)
            ],
            out_specs=pl.BlockSpec((tn, C), lambda i: (i, 0)),
        ),
        compiler_params=pltpu.CompilerParams(
            dimension_semantics=("parallel",),
            vmem_limit_bytes=vmem_limit_bytes,
        ),
    )(x, memb, expand, w_fold, b_fold)


def _reference(x, gamma, beta, weight, bias, num_groups=32):
    """Pure-JAX f32 reference mirroring the torch module."""
    N, C = x.shape
    xf = x.astype(jnp.float32)
    xg = xf.reshape(N, num_groups, C // num_groups)
    mean = xg.mean(-1, keepdims=True)
    var = ((xg - mean) ** 2).mean(-1, keepdims=True)
    xn = ((xg - mean) * jax.lax.rsqrt(var + EPS)).reshape(N, C)
    xn = (xn * gamma + beta).astype(x.dtype).astype(jnp.float32)
    y = xn @ weight.T.astype(jnp.float32) + bias
    y = y * jax.nn.sigmoid(y)
    return (xf + y).astype(x.dtype)


if __name__ == "__main__":
    in_channels = out_channels = 64   # GroupNorm(32, C) requires C % 32 == 0
    batch = 16

    key = jax.random.PRNGKey(0)
    kx, kg, kbe, kw, kb = jax.random.split(key, 5)

    x = jax.random.normal(kx, (batch, in_channels), dtype=jnp.float32)
    # Non-trivial affine params so the gamma/beta folding is actually exercised.
    gamma = 1.0 + 0.1 * jax.random.normal(kg, (out_channels,), jnp.float32)
    beta = 0.1 * jax.random.normal(kbe, (out_channels,), jnp.float32)
    bound = 1.0 / (in_channels ** 0.5)
    weight = jax.random.uniform(kw, (out_channels, in_channels), jnp.float32, -bound, bound)
    bias = jax.random.uniform(kb, (out_channels,), jnp.float32, -bound, bound)

    ref = _reference(x, gamma, beta, weight, bias)

    # Default (large-tile) config: single grid step at this demo size.
    out = jax.block_until_ready(res_mlp_block(x, gamma, beta, weight, bias))
    # Small tile to also exercise a multi-step grid (production default stays at 256).
    out_tiled = jax.block_until_ready(
        res_mlp_block(x, gamma, beta, weight, bias, tile_n=8))

    assert out.shape == (batch, out_channels)
    # All matmuls feed the MXU bf16 operands with f32 accumulation (TPU-native), so compare
    # against the f32 reference with a bf16-level tolerance; the re-centred GroupNorm stats
    # keep the normalization accurate at that precision.
    assert jnp.allclose(out, ref, atol=2e-2, rtol=2e-2), "mismatch vs reference"
    assert jnp.allclose(out_tiled, ref, atol=2e-2, rtol=2e-2), "mismatch vs reference (tiled)"

    print("KERNEL_OK")
</pallas_src>

<mosaic_0001>
module attributes {stable_mosaic.version = 11 : i64} {
  func.func @kernel(%arg0: i32, %arg1: memref<16x64xf32, #tpu.memory_space<vmem>>, %arg2: memref<64x32xbf16, #tpu.memory_space<vmem>>, %arg3: memref<32x64xbf16, #tpu.memory_space<vmem>>, %arg4: memref<64x64xbf16, #tpu.memory_space<vmem>>, %arg5: memref<1x64xf32, #tpu.memory_space<vmem>>, %arg6: memref<16x64xf32, #tpu.memory_space<vmem>>) attributes {dimension_semantics = [#tpu.dimension_semantics<parallel>], iteration_bounds = array<i64: 1>, scalar_prefetch = 0 : i64, scratch_operands = 0 : i64, tpu.core_type = #tpu.core_type<tc>, window_params = [{transform_indices = @transform_0, window_bounds = array<i64: 16, 64>}, {pipeline_mode = #tpu.pipeline_mode<synchronous>, transform_indices = @transform_1, window_bounds = array<i64: 64, 32>}, {pipeline_mode = #tpu.pipeline_mode<synchronous>, transform_indices = @transform_2, window_bounds = array<i64: 32, 64>}, {pipeline_mode = #tpu.pipeline_mode<synchronous>, transform_indices = @transform_3, window_bounds = array<i64: 64, 64>}, {pipeline_mode = #tpu.pipeline_mode<synchronous>, transform_indices = @transform_4, window_bounds = array<i64: 1, 64>}, {transform_indices = @transform_5, window_bounds = array<i64: 16, 64>}]} {
    %c0 = arith.constant 0 : index
    %c0_0 = arith.constant 0 : index
    %0 = vector.load %arg1[%c0, %c0_0] : memref<16x64xf32, #tpu.memory_space<vmem>>, vector<16x64xf32>
    %c0_1 = arith.constant 0 : index
    %c0_2 = arith.constant 0 : index
    %1 = vector.load %arg2[%c0_1, %c0_2] : memref<64x32xbf16, #tpu.memory_space<vmem>>, vector<64x32xbf16>
    %c0_3 = arith.constant 0 : index
    %c0_4 = arith.constant 0 : index
    %2 = vector.load %arg3[%c0_3, %c0_4] : memref<32x64xbf16, #tpu.memory_space<vmem>>, vector<32x64xbf16>
    %3 = arith.truncf %0 : vector<16x64xf32> to vector<16x64xbf16>
    %cst = arith.constant dense<0.000000e+00> : vector<16x32xf32>
    %4 = tpu.matmul %3, %1, %cst {dimension_numbers = #tpu.dot_dimension_numbers<[1], [0], [0], [1], [0, 0, 1, 1], [], []>} : vector<16x64xbf16>, vector<64x32xbf16>, vector<16x32xf32> -> vector<16x32xf32>
    %cst_5 = arith.constant 5.000000e-01 : f32
    %5 = vector.broadcast %cst_5 : f32 to vector<16x32xf32>
    %6 = arith.mulf %4, %5 : vector<16x32xf32>
    %7 = arith.truncf %6 : vector<16x32xf32> to vector<16x32xbf16>
    %cst_6 = arith.constant dense<0.000000e+00> : vector<16x64xf32>
    %8 = tpu.matmul %7, %2, %cst_6 {dimension_numbers = #tpu.dot_dimension_numbers<[1], [0], [0], [1], [0, 0, 1, 1], [], []>} : vector<16x32xbf16>, vector<32x64xbf16>, vector<16x64xf32> -> vector<16x64xf32>
    %9 = arith.subf %0, %8 : vector<16x64xf32>
    %10 = arith.truncf %9 : vector<16x64xf32> to vector<16x64xbf16>
    %11 = arith.mulf %10, %10 : vector<16x64xbf16>
    %12 = tpu.concatenate %10, %11 in 0 : vector<16x64xbf16>, vector<16x64xbf16> -> vector<32x64xbf16>
    %cst_7 = arith.constant dense<0.000000e+00> : vector<32x32xf32>
    %13 = tpu.matmul %12, %1, %cst_7 {dimension_numbers = #tpu.dot_dimension_numbers<[1], [0], [0], [1], [0, 0, 1, 1], [], []>} : vector<32x64xbf16>, vector<64x32xbf16>, vector<32x32xf32> -> vector<32x32xf32>
    %cst_8 = arith.constant 5.000000e-01 : f32
    %14 = vector.broadcast %cst_8 : f32 to vector<32x32xf32>
    %15 = arith.mulf %13, %14 : vector<32x32xf32>
    %16 = vector.extract_strided_slice %15 {offsets = [0, 0], sizes = [16, 32], strides = [1, 1]} : vector<32x32xf32> to vector<16x32xf32>
    %17 = vector.extract_strided_slice %15 {offsets = [16, 0], sizes = [16, 32], strides = [1, 1]} : vector<32x32xf32> to vector<16x32xf32>
    %18 = arith.mulf %16, %16 : vector<16x32xf32>
    %19 = arith.subf %17, %18 : vector<16x32xf32>
    %cst_9 = arith.constant 0.000000e+00 : f32
    %20 = vector.broadcast %cst_9 : f32 to vector<16x32xf32>
    %21 = arith.maximumf %19, %20 : vector<16x32xf32>
    %cst_10 = arith.constant 9.99999974E-6 : f32
    %22 = vector.broadcast %cst_10 : f32 to vector<16x32xf32>
    %23 = arith.addf %21, %22 : vector<16x32xf32>
    %24 = math.rsqrt %23 : vector<16x32xf32>
    %25 = arith.mulf %16, %24 : vector<16x32xf32>
    %26 = tpu.concatenate %25, %24 in 0 : vector<16x32xf32>, vector<16x32xf32> -> vector<32x32xf32>
    %27 = arith.truncf %26 : vector<32x32xf32> to vector<32x32xbf16>
    %cst_11 = arith.constant dense<0.000000e+00> : vector<32x64xf32>
    %28 = tpu.matmul %27, %2, %cst_11 {dimension_numbers = #tpu.dot_dimension_numbers<[1], [0], [0], [1], [0, 0, 1, 1], [], []>} : vector<32x32xbf16>, vector<32x64xbf16>, vector<32x64xf32> -> vector<32x64xf32>
    %29 = vector.extract_strided_slice %28 {offsets = [16, 0], sizes = [16, 64], strides = [1, 1]} : vector<32x64xf32> to vector<16x64xf32>
    %30 = arith.mulf %9, %29 : vector<16x64xf32>
    %31 = vector.extract_strided_slice %28 {offsets = [0, 0], sizes = [16, 64], strides = [1, 1]} : vector<32x64xf32> to vector<16x64xf32>
    %32 = arith.subf %30, %31 : vector<16x64xf32>
    %33 = arith.truncf %32 : vector<16x64xf32> to vector<16x64xbf16>
    %c0_12 = arith.constant 0 : index
    %c0_13 = arith.constant 0 : index
    %34 = vector.load %arg4[%c0_12, %c0_13] : memref<64x64xbf16, #tpu.memory_space<vmem>>, vector<64x64xbf16>
    %cst_14 = arith.constant dense<0.000000e+00> : vector<16x64xf32>
    %35 = tpu.matmul %33, %34, %cst_14 {dimension_numbers = #tpu.dot_dimension_numbers<[1], [0], [0], [1], [0, 0, 1, 1], [], []>} : vector<16x64xbf16>, vector<64x64xbf16>, vector<16x64xf32> -> vector<16x64xf32>
    %c0_15 = arith.constant 0 : index
    %c0_16 = arith.constant 0 : index
    %36 = vector.load %arg5[%c0_15, %c0_16] : memref<1x64xf32, #tpu.memory_space<vmem>>, vector<1x64xf32>
    %37 = vector.broadcast %36 : vector<1x64xf32> to vector<16x64xf32>
    %38 = arith.addf %35, %37 : vector<16x64xf32>
    %39 = arith.negf %38 : vector<16x64xf32>
    %40 = math.exp %39 : vector<16x64xf32>
    %cst_17 = arith.constant 1.000000e+00 : f32
    %41 = vector.broadcast %cst_17 : f32 to vector<16x64xf32>
    %42 = arith.addf %41, %40 : vector<16x64xf32>
    %43 = arith.divf %41, %42 : vector<16x64xf32>
    %44 = arith.mulf %38, %43 : vector<16x64xf32>
    %45 = arith.addf %0, %44 : vector<16x64xf32>
    %c0_18 = arith.constant 0 : index
    %c0_19 = arith.constant 0 : index
    %46 = vector.load %arg6[%c0_18, %c0_19] : memref<16x64xf32, #tpu.memory_space<vmem>>, vector<16x64xf32>
    tpu.vector_store %arg6[%c0_18, %c0_19], %45 {strides = array<i32>} : memref<16x64xf32, #tpu.memory_space<vmem>>, vector<16x64xf32>,
    return
  }
  func.func @transform_0(%arg0: i32) -> (i32, i32) {
    %c0_i32 = arith.constant 0 : i32
    %c0_i32_0 = arith.constant 0 : i32
    return %arg0, %c0_i32 : i32, i32
  }
  func.func @transform_1(%arg0: i32) -> (i32, i32) {
    %c0_i32 = arith.constant 0 : i32
    %c0_i32_0 = arith.constant 0 : i32
    %c0_i32_1 = arith.constant 0 : i32
    return %c0_i32, %c0_i32_0 : i32, i32
  }
  func.func @transform_2(%arg0: i32) -> (i32, i32) {
    %c0_i32 = arith.constant 0 : i32
    %c0_i32_0 = arith.constant 0 : i32
    %c0_i32_1 = arith.constant 0 : i32
    return %c0_i32, %c0_i32_0 : i32, i32
  }
  func.func @transform_3(%arg0: i32) -> (i32, i32) {
    %c0_i32 = arith.constant 0 : i32
    %c0_i32_0 = arith.constant 0 : i32
    %c0_i32_1 = arith.constant 0 : i32
    return %c0_i32, %c0_i32_0 : i32, i32
  }
  func.func @transform_4(%arg0: i32) -> (i32, i32) {
    %c0_i32 = arith.constant 0 : i32
    %c0_i32_0 = arith.constant 0 : i32
    %c0_i32_1 = arith.constant 0 : i32
    return %c0_i32, %c0_i32_0 : i32, i32
  }
  func.func @transform_5(%arg0: i32) -> (i32, i32) {
    %c0_i32 = arith.constant 0 : i32
    %c0_i32_0 = arith.constant 0 : i32
    return %arg0, %c0_i32 : i32, i32
  }
}

</mosaic_0001>

<bundles_post_ra>
// kernel: tpu_custom_call.1
= control target key start
LH: loop header
LB: loop body
LE: loop exit
PB: predicated region body
PF: predicated region fallthrough
CT: control target
= control target key end

     0   :  { %10 = vsyncpa [#allocation3], 0  ;;  %s922_s0 = inlined_call_operand.hbm [shape: f32[16,64], index: 0, kind: input, shape index: {}]   ;;  %s923_s1 = inlined_call_operand.hbm [shape: bf16[64,32], index: 1, kind: input, shape index: {}]   ;;  %s924_s2 = inlined_call_operand.hbm [shape: bf16[32,64], index: 2, kind: input, shape index: {}]   ;;  %s925_s3 = inlined_call_operand.hbm [shape: bf16[64,64], index: 3, kind: input, shape index: {}]   ;;  %s926_s4 = inlined_call_operand.hbm [shape: f32[1,64], index: 4, kind: input, shape index: {}]   ;;  %s927_s5 = inlined_call_operand.hbm [shape: f32[16,64], index: 5, kind: output, shape index: {}]  }
   0x1   :  { %11 = vsyncpa [#allocation6], 0 }
   0x2   :  { %12 = vsyncpa [#allocation9], 0 }
   0x3   :  { %13 = vsyncpa [#allocation4], 0  ;;  %s758_s18 = smov [#allocation5]   ;;  %s618_s22 = scalar_lea.hbm %s923_s1, 512 }
   0x4   :  { %s31_s19 = sshll.u32 %s758_s18, 4  ;;  %p619_p0 = scmp.ne.s32.totalorder %s923_s1, %s618_s22  ;;  %s32_s19 = int_to_ptr.vmem [resolvable:$true] %s31_s19 }
   0x5   :  { %p622_p1 = scmp.lt.u32.totalorder %s618_s22, %s923_s1 }
   0x7   :  { %p624_p2 = pnand %p622_p1, %p619_p0 }
   0x9   :  { %627 = shalt.err (!%p624_p2)
}
   0xa   :  { %s628_s27 = scalar_lea.vmem %s32_s19, 512  ;;  %p633_p4 = scmp.lt.s32.totalorder %s32_s19, %s32_s19 }
   0xb   :  { %p629_p3 = scmp.ne.s32.totalorder %s32_s19, %s628_s27  ;;  %p634_p5 = scmp.lt.s32.totalorder %s628_s27, %s628_s27 }
   0xd   :  { %p635_p6 = por %p634_p5, %p633_p4 }
   0xf   :  { %p636_p7 = pnand %p635_p6, %p629_p3 }
  0x11   :  { %639 = shalt.err (!%p636_p7)
}
  0x12   :  { %s759_s28 = smov 64   ;;  %s760_s29 = smov 4  }
  0x13   :  { %37 = dma.hbm_to_vmem [thread:$0]  %s923_s1, 512, %s32_s19, [#allocation6], %s759_s28, %s759_s28, %s760_s29  }
  0x14   :  { %s761_s7 = smov [#allocation8]   ;;  %s762_s9 = smov [#allocation2]  }
  0x15   :  { %s55_s8 = sshll.u32 %s761_s7, 4  ;;  %s19_s10 = sshll.u32 %s762_s9, 4  ;;  %s56_s8 = int_to_ptr.vmem [resolvable:$true] %s55_s8  ;;  %s20_s10 = int_to_ptr.vmem [resolvable:$true] %s19_s10 }
  0x16   :  { %s640_s13 = scalar_lea.hbm %s925_s3, 512 }
  0x17   :  { %p641_p8 = scmp.ne.s32.totalorder %s925_s3, %s640_s13  ;;  %p644_p9 = scmp.lt.u32.totalorder %s640_s13, %s925_s3 }
  0x19   :  { %p646_p10 = pnand %p644_p9, %p641_p8 }
  0x1b   :  { %649 = shalt.err (!%p646_p10)
}
  0x1c   :  { %s650_s1 = scalar_lea.vmem %s56_s8, 512  ;;  %p655_p12 = scmp.lt.s32.totalorder %s56_s8, %s56_s8 }
  0x1d   :  { %p651_p11 = scmp.ne.s32.totalorder %s56_s8, %s650_s1  ;;  %p656_p13 = scmp.lt.s32.totalorder %s650_s1, %s650_s1 }
  0x1f   :  { %p657_p0 = por %p656_p13, %p655_p12 }
  0x21   :  { %p658_p1 = pnand %p657_p0, %p651_p11 }
  0x23   :  { %661 = shalt.err (!%p658_p1)
}
  0x24   :  { %61 = dma.hbm_to_vmem [thread:$0]  %s925_s3, 512, %s56_s8, [#allocation9], %s759_s28, %s759_s28, %s760_s29  }
  0x25   :  { %s662_s22 = scalar_lea.hbm %s922_s0, 256 }
  0x26   :  { %p663_p2 = scmp.ne.s32.totalorder %s922_s0, %s662_s22  ;;  %p666_p3 = scmp.lt.u32.totalorder %s662_s22, %s922_s0 }
  0x28   :  { %p668_p4 = pnand %p666_p3, %p663_p2 }
  0x2a   :  { %671 = shalt.err (!%p668_p4)
}
  0x2b   :  { %s672_s27 = scalar_lea.vmem %s20_s10, 256  ;;  %p677_p6 = scmp.lt.s32.totalorder %s20_s10, %s20_s10 }
  0x2c   :  { %p673_p5 = scmp.ne.s32.totalorder %s20_s10, %s672_s27  ;;  %p678_p7 = scmp.lt.s32.totalorder %s672_s27, %s672_s27 }
  0x2e   :  { %p679_p8 = por %p678_p7, %p677_p6 }
  0x30   :  { %p680_p9 = pnand %p679_p8, %p673_p5 }
  0x32   :  { %683 = shalt.err (!%p680_p9)
}
  0x33   :  { %s763_s3 = smov 128   ;;  %s764_s30 = smov 8  }
  0x34   :  { %25 = dma.hbm_to_vmem [thread:$0]  %s922_s0, 256, %s20_s10, [#allocation3], %s763_s3, %s763_s3, %s764_s30  }
  0x35   :  { %s765_s8 = smov [#allocation7]   ;;  %s766_s11 = smov [#allocation10]  }
  0x36   :  { %s43_s9 = sshll.u32 %s765_s8, 4  ;;  %s68_s12 = sshll.u32 %s766_s11, 4  ;;  %s44_s9 = int_to_ptr.vmem [resolvable:$true] %s43_s9  ;;  %s69_s12 = int_to_ptr.vmem [resolvable:$true] %s68_s12 }
  0x37   :  { %s684_s15 = scalar_lea.hbm %s924_s2, 256 }
  0x38   :  { %p685_p10 = scmp.ne.s32.totalorder %s924_s2, %s684_s15  ;;  %p688_p11 = scmp.lt.u32.totalorder %s684_s15, %s924_s2 }
  0x3a   :  { %p690_p12 = pnand %p688_p11, %p685_p10 }
  0x3c   :  { %693 = shalt.err (!%p690_p12)
}
  0x3d   :  { %s694_s0 = scalar_lea.vmem %s44_s9, 256  ;;  %p699_p0 = scmp.lt.s32.totalorder %s44_s9, %s44_s9 }
  0x3e   :  { %p695_p13 = scmp.ne.s32.totalorder %s44_s9, %s694_s0  ;;  %p700_p1 = scmp.lt.s32.totalorder %s694_s0, %s694_s0 }
  0x40   :  { %p701_p2 = por %p700_p1, %p699_p0 }
  0x42   :  { %p702_p3 = pnand %p701_p2, %p695_p13 }
  0x44   :  { %705 = shalt.err (!%p702_p3)
}
  0x45   :  { %49 = dma.hbm_to_vmem [thread:$0]  %s924_s2, 256, %s44_s9, [#allocation6], %s759_s28, %s759_s28, %s760_s29  }
  0x46   :  { %s706_s22 = scalar_lea.hbm %s926_s4, 16 }
  0x47   :  { %p707_p4 = scmp.ne.s32.totalorder %s926_s4, %s706_s22  ;;  %p710_p5 = scmp.lt.u32.totalorder %s706_s22, %s926_s4 }
  0x49   :  { %p712_p6 = pnand %p710_p5, %p707_p4 }
  0x4b   :  { %715 = shalt.err (!%p712_p6)
}
  0x4c   :  { %s716_s27 = scalar_lea.vmem %s69_s12, 16  ;;  %s720_s6 = scalar_lea.vmem %s69_s12, 32 }
  0x4d   :  { %p717_p7 = scmp.ne.s32.totalorder %s69_s12, %s716_s27  ;;  %p721_p8 = scmp.lt.s32.totalorder %s69_s12, %s69_s12 }
  0x4e   :  { %p722_p9 = scmp.lt.s32.totalorder %s720_s6, %s716_s27 }
  0x50   :  { %p723_p10 = por %p722_p9, %p721_p8 }
  0x52   :  { %p724_p11 = pnand %p723_p10, %p717_p7 }
  0x54   :  { %727 = shalt.err (!%p724_p11)
}
  0x55   :  { %71 = dma.hbm_to_vmem [thread:$0]  %s926_s4, 16, %s69_s12, [#allocation9]  }
  0x56   :  { %750 = dma.done.wait [#allocation3], 256  }
  0x57   :  { %751 = vsyncadd [#allocation3], 4294967040 }
  0x58   :  { %752 = dma.done.wait [#allocation6], 768  }
  0x59   :  { %753 = vsyncadd [#allocation6], 4294966528 }
  0x5a   :  { %754 = dma.done.wait [#allocation9], 528  }
  0x5b   :  { %755 = vsyncadd [#allocation9], 4294966768  ;;  %v767_v0 = vmov 0.0   ;;  %vm768_vm0 = vmmov 0   ;;  %v596_v1 = vld [vmem:[#allocation5] sm:$0xff]   ;;  %v597_v2 = vld [vmem:[#allocation5 + $0x8] sm:$0xff]  }
  0x5c   :  { %532 = vmatprep.subr.bf16.mxu0 %v767_v0  ;;  %540 = vmatprep.mubr.msk.bf16.mxu0 %vm768_vm0, %v767_v0  ;;  %v598_v3 = vld [vmem:[#allocation5 + $0x10] sm:$0xff]   ;;  %v599_v4 = vld [vmem:[#allocation5 + $0x18] sm:$0xff]   ;;  %vm127_vm1 = vcmask 523264   ;;  %v600_v8 = vld [vmem:[#allocation7] sm:$0xff]   ;;  %vm187_vm2 = vcmask 261120   ;;  %s769_s4 = smov [#allocation11]  }
  0x5d   :  { %544 = vmatprep.subr.bf16.mxu1 %v767_v0  ;;  %548 = vmatprep.mubr.msk.bf16.mxu1 %vm768_vm0, %v767_v0  ;;  %v880_v5 = vld [vmem:[#allocation2] sm:$0xff]  ;;  %v882_v6 = vld [vmem:[#allocation2 + $0x8] sm:$0xff]  ;;  %v601_v9 = vld [vmem:[#allocation7 + $0x8] sm:$0xff]   ;;  %s475_s29 = sshll.u32 %s769_s4, 4  ;;  %s476_s29 = int_to_ptr.vmem [resolvable:$true] %s475_s29 }
  0x5e   :  { %533 = vmatpush3.bf16.msra.mxu0 %v596_v1  ;;  %v102_v7 = vpack.c.bf16 %v882_v6, %v880_v5  ;;  %545 = vmatpush3.bf16.msra.mxu1 %v600_v8  ;;  %v602_v25 = vld [vmem:[#allocation8] sm:$0xff]   ;;  %v603_v26 = vld [vmem:[#allocation8 + $0x8] sm:$0xff]   ;;  %v604_v49 = vld [vmem:[#allocation8 + $0x10] sm:$0xff]   ;;  %s728_s7 = scalar_lea.vmem %s476_s29, 256  ;;  %p733_p13 = scmp.lt.s32.totalorder %s476_s29, %s476_s29 }
  0x5f   :  { %534 = vmatprep.subr.bf16.mxu0 %v767_v0  ;;  %546 = vmatprep.subr.bf16.mxu1 %v767_v0  ;;  %v605_v50 = vld [vmem:[#allocation8 + $0x18] sm:$0xff]   ;;  %v501_v60 = vld [vmem:[#allocation10] ss:$0 sm:$0xff]  ;;  %p729_p12 = scmp.ne.s32.totalorder %s476_s29, %s728_s7  ;;  %p734_p0 = scmp.lt.s32.totalorder %s728_s7, %s728_s7 }
  0x61   :  { %p735_p1 = por %p734_p0, %p733_p13 }
  0x62   :  { %535 = vmatpush3.bf16.msra.mxu0 %v597_v2  ;;  %547 = vmatpush3.bf16.msra.mxu1 %v601_v9 }
  0x63   :  { %536 = vmatprep.subr.bf16.mxu0 %v767_v0  ;;  %552 = vmatprep.subr.bf16.mxu1 %v596_v1  ;;  %p736_p2 = pnand %p735_p1, %p729_p12 }
  0x66   :  { %537 = vmatpush3.bf16.msra.mxu0 %v598_v3 }
  0x67   :  { %538 = vmatprep.subr.bf16.mxu0 %v767_v0 }
  0x6a   :  { %539 = vmatpush3.bf16.msra.mxu0 %v599_v4 }
  0x6b   :  { %572 = vmatprep.subr.bf16.mxu0 %v767_v0 }
  0x6d   :  { %541 = vmatmul.mubr.msk.bf16.vlgmr.msra.gmra.mrb[0].mxu0 %vm127_vm1, %v102_v7 }
  0x6e   :  { %580 = vmatprep.mubr.msk.bf16.mxu0 %vm768_vm0, %v767_v0  ;;  %573 = vmatpush3.bf16.msra.mxu0 %v602_v25 }
  0x6f   :  { %574 = vmatprep.subr.bf16.mxu0 %v767_v0 }
  0x72   :  { %575 = vmatpush3.bf16.msra.mxu0 %v603_v26 }
  0x73   :  { %576 = vmatprep.subr.bf16.mxu0 %v767_v0 }
  0x76   :  { %577 = vmatpush3.bf16.msra.mxu0 %v604_v49 }
  0x77   :  { %578 = vmatprep.subr.bf16.mxu0 %v767_v0 }
  0x7a   :  { %579 = vmatpush3.bf16.msra.mxu0 %v605_v50 }
 0x140   :  { %v165_v10 = vpop.f32.mrb[0].mxu0 }
 0x141   :  { %v542_v11 = vpop.f32.mrb[1].mxu0  ;;  %v172_v13 = vmul.f32 0.5, %v165_v10 }
 0x142   :  { %v168_v12 = vpop.f32.mrb[2].mxu0 }
 0x143   :  { %v173_v14 = vmul.f32 0.5, %v168_v12  ;;  %v543_v15 = vpop.f32.mrb[3].mxu0 }
 0x145   :  { %v174_v16 = vpack.c.bf16 %v173_v14, %v172_v13 }
 0x147   :  { %549 = vmatmul.mubr.msk.bf16.vlgmr.msra.gmra.mrb[0].mxu1 %vm187_vm2, %v174_v16 }
 0x148   :  { %553 = vmatpush3.bf16.msra.mxu1 %v596_v1 }
 0x149   :  { %554 = vmatprep.subr.bf16.mxu1 %v597_v2 }
 0x14c   :  { %555 = vmatpush3.bf16.msra.mxu1 %v597_v2 }
 0x14d   :  { %556 = vmatprep.subr.bf16.mxu1 %v598_v3 }
 0x150   :  { %557 = vmatpush3.bf16.msra.mxu1 %v598_v3 }
 0x151   :  { %558 = vmatprep.subr.bf16.mxu1 %v599_v4 }
 0x154   :  { %559 = vmatpush3.bf16.msra.mxu1 %v599_v4 }
 0x155   :  { %564 = vmatprep.subr.bf16.mxu1 %v600_v8 }
 0x21a   :  { %v225_v17 = vpop.f32.mrb[0].mxu1 }
 0x21b   :  { %v550_v18 = vpop.f32.mrb[1].mxu1  ;;  %v232_v20 = vsub.f32 %v880_v5, %v225_v17 }
 0x21c   :  { %v228_v19 = vpop.f32.mrb[2].mxu1 }
 0x21d   :  { %v233_v21 = vsub.f32 %v882_v6, %v228_v19  ;;  %v551_v22 = vpop.f32.mrb[3].mxu1 }
 0x21f   :  { %v234_v23 = vpack.c.bf16 %v233_v21, %v232_v20 }
 0x221   :  { %v235_v24 = vmul.bf16 %v234_v23, %v234_v23  ;;  %560 = vmatprep.mubr.msk.bf16.mxu1 %vm127_vm1, %v234_v23 }
 0x223   :  { %561 = vmatmul.mubr.msk.bf16.vlgmr.msra.gmra.mrb[4].mxu1 %vm127_vm1, %v235_v24 }
 0x224   :  { %565 = vmatpush3.bf16.msra.mxu1 %v600_v8 }
 0x225   :  { %566 = vmatprep.subr.bf16.mxu1 %v601_v9 }
 0x228   :  { %567 = vmatpush3.bf16.msra.mxu1 %v601_v9 }
 0x2f6   :  { %v562_v27 = vpop.f32.mrb[4].mxu1 }
 0x2f7   :  { %v276_v28 = vpop.f32.mrb[5].mxu1  ;;  %v293_v32 = vmul.f32 0.5, %v562_v27 }
 0x2f8   :  { %v291_v29 = vmul.f32 0.5, %v276_v28  ;;  %v563_v30 = vpop.f32.mrb[6].mxu1 }
 0x2f9   :  { %v279_v31 = vpop.f32.mrb[7].mxu1  ;;  %v294_v36 = vmul.f32 0.5, %v563_v30 }
 0x2fa   :  { %v295_v33 = vmul.f32 %v291_v29, %v291_v29  ;;  %v292_v34 = vmul.f32 0.5, %v279_v31 }
 0x2fc   :  { %v297_v35 = vsub.f32 %v293_v32, %v295_v33  ;;  %v296_v37 = vmul.f32 %v292_v34, %v292_v34 }
 0x2fe   :  { %v299_v38 = vmax.f32 %v297_v35, 0.0  ;;  %v298_v39 = vsub.f32 %v294_v36, %v296_v37 }
 0x300   :  { %v301_v40 = vadd.f32 1e-05, %v299_v38  ;;  %v300_v41 = vmax.f32 %v298_v39, 0.0 }
 0x302   :  { %606 = vrsqrt.f32 %v301_v40  ;;  %v302_v42 = vadd.f32 1e-05, %v300_v41 }
 0x304   :  { %608 = vrsqrt.f32 %v302_v42 }
 0x30c   :  { %v607_v43 = vpop.eup %606 }
 0x30d   :  { %v305_v44 = vmul.f32 %v607_v43, %v291_v29 }
 0x30e   :  { %v609_v45 = vpop.eup %608 }
 0x30f   :  { %v306_v46 = vmul.f32 %v609_v45, %v292_v34  ;;  %v308_v47 = vpack.c.bf16 %v609_v45, %v607_v43 }
 0x311   :  { %v307_v48 = vpack.c.bf16 %v306_v46, %v305_v44 }
 0x313   :  { %568 = vmatprep.mubr.msk.bf16.mxu1 %vm187_vm2, %v307_v48 }
 0x314   :  { %569 = vmatmul.mubr.msk.bf16.vlgmr.msra.gmra.mrb[8].mxu1 %vm187_vm2, %v308_v47 }
 0x3e7   :  { %v570_v51 = vpop.f32.mrb[8].mxu1 }
 0x3e8   :  { %v364_v52 = vmul.f32 %v570_v51, %v232_v20  ;;  %v349_v53 = vpop.f32.mrb[9].mxu1 }
 0x3e9   :  { %v571_v54 = vpop.f32.mrb[10].mxu1 }
 0x3ea   :  { %v366_v55 = vsub.f32 %v364_v52, %v349_v53  ;;  %v365_v56 = vmul.f32 %v571_v54, %v233_v21  ;;  %v352_v57 = vpop.f32.mrb[11].mxu1 }
 0x3ec   :  { %v367_v58 = vsub.f32 %v365_v56, %v352_v57 }
 0x3ee   :  { %v368_v59 = vpack.c.bf16 %v367_v58, %v366_v55 }
 0x3f0   :  { %581 = vmatmul.mubr.msk.bf16.vlgmr.msra.gmra.mrb[4].mxu0 %vm127_vm1, %v368_v59 }
 0x4c3   :  { %v445_v61 = vpop.f32.mrb[4].mxu0 }
 0x4c4   :  { %v446_v62 = vadd.f32 %v501_v60, %v445_v61  ;;  %v582_v63 = vpop.f32.mrb[5].mxu0 }
 0x4c5   :  { %v448_v1 = vpop.f32.mrb[6].mxu0 }
 0x4c6   :  { %v507_v2 = vmul.f32 -1.442695, %v446_v62  ;;  %v449_v0 = vadd.f32 %v501_v60, %v448_v1  ;;  %v583_v3 = vpop.f32.mrb[7].mxu0 }
 0x4c8   :  { %610 = vpow2.f32 %v507_v2  ;;  %v508_v4 = vmul.f32 -1.442695, %v449_v0 }
 0x4ca   :  { %612 = vpow2.f32 %v508_v4 }
 0x4d2   :  { %v611_v7 = vpop.eup %610 }
 0x4d3   :  { %v458_v8 = vadd.f32 1.0, %v611_v7 }
 0x4d4   :  { %v613_v9 = vpop.eup %612 }
 0x4d5   :  { %614 = vrcp.f32 %v458_v8  ;;  %v459_v10 = vadd.f32 1.0, %v613_v9 }
 0x4d7   :  { %616 = vrcp.f32 %v459_v10 }
 0x4df   :  { %v615_v11 = vpop.eup %614 }
 0x4e0   :  { %v464_v12 = vmul.f32 %v615_v11, %v446_v62 }
 0x4e1   :  { %v617_v13 = vpop.eup %616 }
 0x4e2   :  { %v466_v14 = vadd.f32 %v464_v12, %v880_v5  ;;  %v465_v15 = vmul.f32 %v617_v13, %v449_v0 }
 0x4e4   :  { %468 = vst.msk [vmem:[#allocation11] sm:$0xff] %vm127_vm1, %v466_v14  ;;  %v467_v16 = vadd.f32 %v465_v15, %v882_v6 }
 0x4e6   :  { %469 = vst.msk [vmem:[#allocation11 + $0x8] sm:$0xff] %vm127_vm1, %v467_v16 }
 0x4e7   :  { %739 = shalt.err (!%p736_p2)
}
 0x4e8   :  { %s740_s11 = scalar_lea.hbm %s927_s5, 256 }
 0x4e9   :  { %p741_p3 = scmp.ne.s32.totalorder %s927_s5, %s740_s11  ;;  %p744_p4 = scmp.lt.u32.totalorder %s740_s11, %s927_s5 }
 0x4eb   :  { %p746_p5 = pnand %p744_p4, %p741_p3 }
 0x4ed   :  { %749 = shalt.err (!%p746_p5)
}
 0x4ee   :  { %481 = dma.vmem_to_hbm [thread:$0]  %s476_s29, 256, %s927_s5, [#allocation4], %s763_s3, %s763_s3, %s764_s30  }
 0x4ef   :  { %756 = dma.done.wait [#allocation4], 256  }
 0x4f0   :  { %757 = vsyncadd [#allocation4], 4294967040 }
 0x4f1   :  { %485 = vsyncpa [#allocation3], 1 }
 0x4f2   :  { %486 = vsyncpa [#allocation6], 1 }
 0x4f3   :  { %487 = vsyncpa [#allocation9], 1 }
 0x4f4   :  { %488 = vsyncpa [#allocation4], 1 }

</bundles_post_ra>
